<compile_context>
chip_gen: v5e
topology: v5e:2x2
jax: 0.10.0
libtpu: 0.0.40
codegen_flags: <defaults>
</compile_context>

<pallas_src>
import functools

import jax
import jax.numpy as jnp
from jax.experimental import pallas as pl
from jax.experimental.pallas import tpu as pltpu

EPS = 1e-5
LANE = 128
SUBLANE = 8


# ---------------------------------------------------------------------------
# VMEM budgeting (generation aware, conservative fallbacks)
# ---------------------------------------------------------------------------
def _physical_vmem_bytes():
    try:
        info = pltpu.get_tpu_info()
        for attr in ("vmem_capacity_bytes", "vmem_bytes", "vmem_size_bytes"):
            v = getattr(info, attr, None)
            if isinstance(v, int) and v > 0:
                return v
    except Exception:
        pass
    return 64 * 1024 * 1024  # conservative: v7x per-TensorCore VMEM


def _round_up(x, m):
    return (x + m - 1) // m * m


def _pick_tile_c(c_pad, per_col_bytes, budget):
    """Largest multiple of 128 that divides c_pad and fits the VMEM budget."""
    m = c_pad // LANE
    best = LANE
    for d in range(1, m + 1):
        if m % d:
            continue
        tc = d * LANE
        if tc * per_col_bytes <= budget:
            best = tc
    # Megacore nudge: if a single tile covers all of C and it is splittable,
    # use two tiles so v7x's 2 TensorCores both get work (cheap elsewhere).
    if best == c_pad and m >= 2 and m % 2 == 0:
        best = c_pad // 2
    return best


def _pick_two_pass_tiles(c_pad, n, in_b, out_b, budget):
    # Modest, lane-dense channel tile that divides the padded C.
    tc = LANE
    m = c_pad // LANE
    for d in range(1, m + 1):
        if m % d == 0 and d * LANE <= 512:
            tc = d * LANE
    per_elem = 2 * in_b + 2 * out_b + 8  # double-buffered in+out + f32 temps
    tn = budget // (per_elem * tc)
    tn = max(SUBLANE, (tn // SUBLANE) * SUBLANE)
    tn = min(tn, 4096, _round_up(n, SUBLANE))
    return tc, tn


# ---------------------------------------------------------------------------
# Kernels
# ---------------------------------------------------------------------------
def _bn1d_onepass_kernel(x_ref, g_ref, b_ref, o_ref, *, eps):
    """Whole batch resident for one channel tile: exact two-pass (centered) var."""
    xf = x_ref[...].astype(jnp.float32)                      # (N, tile_c)
    inv_n = 1.0 / xf.shape[0]
    mean = jnp.sum(xf, axis=0, keepdims=True) * inv_n        # (1, tile_c)
    xc = xf - mean
    var = jnp.sum(xc * xc, axis=0, keepdims=True) * inv_n    # biased var
    scale = jax.lax.rsqrt(var + eps) * g_ref[...].astype(jnp.float32)
    bias = b_ref[...].astype(jnp.float32) - mean * scale
    o_ref[...] = (xf * scale + bias).astype(o_ref.dtype)     # single fma per elem


def _bn1d_stats_kernel(x_ref, g_ref, b_ref, scale_ref, bias_ref,
                       sum_ref, sq_ref, *, eps, n_true):
    """Large-N pass 1: accumulate per-channel sum / sumsq over batch tiles."""
    ni = pl.program_id(1)

    @pl.when(ni == 0)
    def _():
        sum_ref[...] = jnp.zeros_like(sum_ref)
        sq_ref[...] = jnp.zeros_like(sq_ref)

    xf = x_ref[...].astype(jnp.float32)
    sum_ref[...] += jnp.sum(xf, axis=0, keepdims=True)
    sq_ref[...] += jnp.sum(xf * xf, axis=0, keepdims=True)

    @pl.when(ni == pl.num_programs(1) - 1)
    def _():
        inv_n = 1.0 / n_true          # true (unpadded) batch size
        mean = sum_ref[...] * inv_n
        # E[x^2] - mean^2 (padded zero rows contribute nothing); clamp for
        # the rare catastrophic-cancellation negative.
        var = jnp.maximum(sq_ref[...] * inv_n - mean * mean, 0.0)
        scale = jax.lax.rsqrt(var + eps) * g_ref[...].astype(jnp.float32)
        scale_ref[...] = scale
        bias_ref[...] = b_ref[...].astype(jnp.float32) - mean * scale


def _bn1d_apply_kernel(x_ref, scale_ref, bias_ref, o_ref):
    """Large-N pass 2: y = x * scale + bias, fully tiled over N and C."""
    xf = x_ref[...].astype(jnp.float32)
    o_ref[...] = (xf * scale_ref[...] + bias_ref[...]).astype(o_ref.dtype)


# ---------------------------------------------------------------------------
# Wrapper
# ---------------------------------------------------------------------------
def batch_norm_1d(x, gamma, beta, *, eps=EPS, force_two_pass=False,
                  tile_c=None, tile_n=None):
    """Training-mode BatchNorm1d forward.  x: (N, C); gamma/beta: (C,)."""
    N, C = x.shape
    in_b = jnp.dtype(x.dtype).itemsize
    out_b = in_b

    phys = _physical_vmem_bytes()
    # Working-set budget: safe on v7x (64 MiB physical) and already far past
    # the tile size needed to hit the HBM roofline on v5e/v6e.
    budget = min(int(phys * 0.55), 44 * 1024 * 1024)
    vmem_limit = min(int(phys * 0.75), 64 * 1024 * 1024)
    compiler_params = lambda sem: pltpu.CompilerParams(
        dimension_semantics=sem, vmem_limit_bytes=vmem_limit)

    # Pad the channel axis to a lane multiple (lane-dense DMAs / stores).
    # Padded channels normalize independently and are sliced off afterwards.
    C_pad = _round_up(C, LANE)
    if C_pad != C:
        x_p = jnp.pad(x, ((0, 0), (0, C_pad - C)))
        g_p = jnp.pad(gamma, (0, C_pad - C), constant_values=1.0)
        b_p = jnp.pad(beta, (0, C_pad - C))
    else:
        x_p, g_p, b_p = x, gamma, beta
    g2 = g_p.reshape(1, C_pad)
    b2 = b_p.reshape(1, C_pad)

    # Estimated live bytes per channel column in the one-pass kernel:
    # double-buffered input + output blocks + f32 temporaries.
    per_col = N * (2 * in_b + 2 * out_b + 12)
    one_pass_fits = per_col * LANE <= budget

    if one_pass_fits and not force_two_pass:
        # ----- one-pass path: whole batch resident per channel tile --------
        tc = tile_c if tile_c is not None else _pick_tile_c(C_pad, per_col, budget)
        grid = (C_pad // tc,)
        out_p = pl.pallas_call(
            functools.partial(_bn1d_onepass_kernel, eps=eps),
            out_shape=jax.ShapeDtypeStruct((N, C_pad), x.dtype),
            grid_spec=pltpu.PrefetchScalarGridSpec(
                num_scalar_prefetch=0,
                grid=grid,
                in_specs=[
                    pl.BlockSpec((N, tc), lambda j: (0, j)),
                    pl.BlockSpec((1, tc), lambda j: (0, j)),
                    pl.BlockSpec((1, tc), lambda j: (0, j)),
                ],
                out_specs=pl.BlockSpec((N, tc), lambda j: (0, j)),
            ),
            compiler_params=compiler_params(("parallel",)),
        )(x_p, g2, b2)
        return out_p[:, :C] if C_pad != C else out_p

    # ----- two-pass path: batch does not fit VMEM (or forced for testing) --
    if tile_c is not None and tile_n is not None:
        tc, tn = tile_c, tile_n
    else:
        tc, tn = _pick_two_pass_tiles(C_pad, N, in_b, out_b, budget)

    N_pad = _round_up(N, tn)
    if N_pad != N:
        # Zero-padded rows contribute nothing to sum/sumsq; we divide by the
        # true N and slice the padded output rows off.
        x_p = jnp.pad(x_p, ((0, N_pad - N), (0, 0)))
    num_c = C_pad // tc
    num_n = N_pad // tn

    scale, bias = pl.pallas_call(
        functools.partial(_bn1d_stats_kernel, eps=eps, n_true=float(N)),
        out_shape=(jax.ShapeDtypeStruct((1, C_pad), jnp.float32),
                   jax.ShapeDtypeStruct((1, C_pad), jnp.float32)),
        grid_spec=pltpu.PrefetchScalarGridSpec(
            num_scalar_prefetch=0,
            grid=(num_c, num_n),
            in_specs=[
                pl.BlockSpec((tn, tc), lambda c, n: (n, c)),
                pl.BlockSpec((1, tc), lambda c, n: (0, c)),
                pl.BlockSpec((1, tc), lambda c, n: (0, c)),
            ],
            out_specs=[
                pl.BlockSpec((1, tc), lambda c, n: (0, c)),
                pl.BlockSpec((1, tc), lambda c, n: (0, c)),
            ],
            scratch_shapes=[pltpu.VMEM((1, tc), jnp.float32),
                            pltpu.VMEM((1, tc), jnp.float32)],
        ),
        compiler_params=compiler_params(("parallel", "arbitrary")),
    )(x_p, g2, b2)

    out_p = pl.pallas_call(
        _bn1d_apply_kernel,
        out_shape=jax.ShapeDtypeStruct((N_pad, C_pad), x.dtype),
        grid_spec=pltpu.PrefetchScalarGridSpec(
            num_scalar_prefetch=0,
            grid=(num_n, num_c),
            in_specs=[
                pl.BlockSpec((tn, tc), lambda n, c: (n, c)),
                pl.BlockSpec((1, tc), lambda n, c: (0, c)),
                pl.BlockSpec((1, tc), lambda n, c: (0, c)),
            ],
            out_specs=pl.BlockSpec((tn, tc), lambda n, c: (n, c)),
        ),
        compiler_params=compiler_params(("parallel", "parallel")),
    )(x_p, scale, bias)

    return out_p[:N, :C]


# ---------------------------------------------------------------------------
# Self-test
# ---------------------------------------------------------------------------
if __name__ == "__main__":
    def bn_ref(x, gamma, beta):
        xf = x.astype(jnp.float32)
        mean = jnp.mean(xf, axis=0, keepdims=True)
        var = jnp.mean((xf - mean) ** 2, axis=0, keepdims=True)  # biased
        y = (xf - mean) * jax.lax.rsqrt(var + EPS) * gamma + beta
        return y.astype(x.dtype)

    key = jax.random.PRNGKey(0)
    k1, k2, k3, kg, kb = jax.random.split(key, 5)

    # Case 1: small module-like shape; C=96 exercises the lane-padding path.
    N, C = 16, 96
    x = jax.random.normal(k1, (N, C), dtype=jnp.float32)
    gamma = 1.0 + 0.1 * jax.random.normal(kg, (C,), dtype=jnp.float32)
    beta = 0.1 * jax.random.normal(kb, (C,), dtype=jnp.float32)
    y = jax.block_until_ready(batch_norm_1d(x, gamma, beta))
    assert jnp.allclose(y, bn_ref(x, gamma, beta), atol=1e-5, rtol=1e-5), \
        "one-pass (padded C) mismatch"

    # Case 2: lane-aligned channels; exercises the multi-tile parallel grid
    # (default nn.BatchNorm1d init: gamma=1, beta=0).
    N2, C2 = 8, 256
    x2 = jax.random.normal(k2, (N2, C2), dtype=jnp.float32)
    g2 = jnp.ones((C2,), jnp.float32)
    b2 = jnp.zeros((C2,), jnp.float32)
    y2 = jax.block_until_ready(batch_norm_1d(x2, g2, b2))
    assert jnp.allclose(y2, bn_ref(x2, g2, b2), atol=1e-5, rtol=1e-5), \
        "one-pass (aligned C) mismatch"

    # Case 3: force the large-N two-pass path at a tiny shape to validate it.
    N3, C3 = 24, 256
    x3 = jax.random.normal(k3, (N3, C3), dtype=jnp.float32)
    g3 = 1.0 + 0.05 * jax.random.normal(kg, (C3,), dtype=jnp.float32)
    b3 = 0.05 * jax.random.normal(kb, (C3,), dtype=jnp.float32)
    y3 = jax.block_until_ready(
        batch_norm_1d(x3, g3, b3, force_two_pass=True, tile_c=128, tile_n=8))
    assert jnp.allclose(y3, bn_ref(x3, g3, b3), atol=1e-4, rtol=1e-5), \
        "two-pass mismatch"

    print("KERNEL_OK")
</pallas_src>

<mosaic_0001>
module attributes {stable_mosaic.version = 11 : i64} {
  func.func @_bn1d_onepass_kernel(%arg0: i32, %arg1: memref<16x128xf32, #tpu.memory_space<vmem>>, %arg2: memref<1x128xf32, #tpu.memory_space<vmem>>, %arg3: memref<1x128xf32, #tpu.memory_space<vmem>>, %arg4: memref<16x128xf32, #tpu.memory_space<vmem>>) attributes {dimension_semantics = [#tpu.dimension_semantics<parallel>], iteration_bounds = array<i64: 1>, scalar_prefetch = 0 : i64, scratch_operands = 0 : i64, tpu.core_type = #tpu.core_type<tc>, window_params = [{transform_indices = @transform_0, window_bounds = array<i64: 16, 128>}, {transform_indices = @transform_1, window_bounds = array<i64: 1, 128>}, {transform_indices = @transform_2, window_bounds = array<i64: 1, 128>}, {transform_indices = @transform_3, window_bounds = array<i64: 16, 128>}]} {
    %c0 = arith.constant 0 : index
    %c0_0 = arith.constant 0 : index
    %0 = vector.load %arg1[%c0, %c0_0] : memref<16x128xf32, #tpu.memory_space<vmem>>, vector<16x128xf32>
    %cst = arith.constant dense<0.000000e+00> : vector<128xf32>
    %1 = vector.multi_reduction <add>, %0, %cst [0] : vector<16x128xf32> to vector<128xf32>
    %2 = vector.shape_cast %1 : vector<128xf32> to vector<1x128xf32>
    %cst_1 = arith.constant 6.250000e-02 : f32
    %3 = vector.broadcast %cst_1 : f32 to vector<1x128xf32>
    %4 = arith.mulf %2, %3 : vector<1x128xf32>
    %5 = vector.broadcast %4 : vector<1x128xf32> to vector<16x128xf32>
    %6 = arith.subf %0, %5 : vector<16x128xf32>
    %7 = arith.mulf %6, %6 : vector<16x128xf32>
    %cst_2 = arith.constant dense<0.000000e+00> : vector<128xf32>
    %8 = vector.multi_reduction <add>, %7, %cst_2 [0] : vector<16x128xf32> to vector<128xf32>
    %9 = vector.shape_cast %8 : vector<128xf32> to vector<1x128xf32>
    %cst_3 = arith.constant 6.250000e-02 : f32
    %10 = vector.broadcast %cst_3 : f32 to vector<1x128xf32>
    %11 = arith.mulf %9, %10 : vector<1x128xf32>
    %cst_4 = arith.constant 9.99999974E-6 : f32
    %12 = vector.broadcast %cst_4 : f32 to vector<1x128xf32>
    %13 = arith.addf %11, %12 : vector<1x128xf32>
    %14 = math.rsqrt %13 : vector<1x128xf32>
    %c0_5 = arith.constant 0 : index
    %c0_6 = arith.constant 0 : index
    %15 = vector.load %arg2[%c0_5, %c0_6] : memref<1x128xf32, #tpu.memory_space<vmem>>, vector<1x128xf32>
    %16 = arith.mulf %14, %15 : vector<1x128xf32>
    %c0_7 = arith.constant 0 : index
    %c0_8 = arith.constant 0 : index
    %17 = vector.load %arg3[%c0_7, %c0_8] : memref<1x128xf32, #tpu.memory_space<vmem>>, vector<1x128xf32>
    %18 = arith.mulf %4, %16 : vector<1x128xf32>
    %19 = arith.subf %17, %18 : vector<1x128xf32>
    %20 = vector.broadcast %16 : vector<1x128xf32> to vector<16x128xf32>
    %21 = arith.mulf %0, %20 : vector<16x128xf32>
    %22 = vector.broadcast %19 : vector<1x128xf32> to vector<16x128xf32>
    %23 = arith.addf %21, %22 : vector<16x128xf32>
    %c0_9 = arith.constant 0 : index
    %c0_10 = arith.constant 0 : index
    %24 = vector.load %arg4[%c0_9, %c0_10] : memref<16x128xf32, #tpu.memory_space<vmem>>, vector<16x128xf32>
    tpu.vector_store %arg4[%c0_9, %c0_10], %23 {strides = array<i32>} : memref<16x128xf32, #tpu.memory_space<vmem>>, vector<16x128xf32>,
    return
  }
  func.func @transform_0(%arg0: i32) -> (i32, i32) {
    %c0_i32 = arith.constant 0 : i32
    %c0_i32_0 = arith.constant 0 : i32
    return %c0_i32, %arg0 : i32, i32
  }
  func.func @transform_1(%arg0: i32) -> (i32, i32) {
    %c0_i32 = arith.constant 0 : i32
    %c0_i32_0 = arith.constant 0 : i32
    return %c0_i32, %arg0 : i32, i32
  }
  func.func @transform_2(%arg0: i32) -> (i32, i32) {
    %c0_i32 = arith.constant 0 : i32
    %c0_i32_0 = arith.constant 0 : i32
    return %c0_i32, %arg0 : i32, i32
  }
  func.func @transform_3(%arg0: i32) -> (i32, i32) {
    %c0_i32 = arith.constant 0 : i32
    %c0_i32_0 = arith.constant 0 : i32
    return %c0_i32, %arg0 : i32, i32
  }
}

</mosaic_0001>

<bundles_post_ra>
// kernel: tpu_custom_call.1
= control target key start
LH: loop header
LB: loop body
LE: loop exit
PB: predicated region body
PF: predicated region fallthrough
CT: control target
= control target key end

     0   :  { %8 = vsyncpa [#allocation3], 0  ;;  %s241_s0 = inlined_call_operand.hbm [shape: f32[16,128], index: 0, kind: input, shape index: {}]   ;;  %s242_s1 = inlined_call_operand.hbm [shape: f32[1,128], index: 1, kind: input, shape index: {}]   ;;  %s243_s2 = inlined_call_operand.vmem [shape: f32[1,128], index: 2, kind: input, shape index: {}]   ;;  %s244_s3 = inlined_call_operand.hbm [shape: f32[16,128], index: 3, kind: output, shape index: {}]  }
   0x1   :  { %9 = vsyncpa [#allocation6], 0 }
   0x2   :  { %10 = vsyncpa [#allocation4], 0  ;;  %s15_s14 = sshll.u32 %s241_s0, 4  ;;  %s198_s15 = smov [#allocation2]   ;;  %s16_s14 = int_to_ptr.hbm [resolvable:$true] %s15_s14 }
   0x3   :  { %s17_s16 = sshll.u32 %s198_s15, 4  ;;  %s29_s19 = sshll.u32 %s242_s1, 4  ;;  %s18_s16 = int_to_ptr.vmem [resolvable:$true] %s17_s16  ;;  %s30_s19 = int_to_ptr.hbm [resolvable:$true] %s29_s19 }
   0x4   :  { %s199_s20 = smov 128   ;;  %s200_s21 = smov 8  }
   0x5   :  { %23 = dma.hbm_to_vmem [thread:$0]  %s16_s14, 256, %s18_s16, [#allocation3], %s199_s20, %s199_s20, %s200_s21  }
   0x6   :  { %s201_s22 = smov [#allocation5]  }
   0x7   :  { %s31_s23 = sshll.u32 %s201_s22, 4  ;;  %s32_s23 = int_to_ptr.vmem [resolvable:$true] %s31_s23 }
   0x8   :  { %34 = dma.hbm_to_vmem [thread:$0]  %s30_s19, 16, %s32_s23, [#allocation6]  }
   0x9   :  { %192 = dma.done.wait [#allocation3], 256  }
   0xa   :  { %193 = vsyncadd [#allocation3], 4294967040 }
   0xb   :  { %194 = dma.done.wait [#allocation6], 16  }
   0xc   :  { %195 = vsyncadd [#allocation6], 4294967280  ;;  %v45_v0 = vld [vmem:[#allocation2] sm:$0xff]  ;;  %v46_v1 = vld [vmem:[#allocation2 + $0x8] sm:$0xff]  ;;  %s202_s24 = smov [#allocation7]   ;;  %s99_s28 = sshll.u32 %s244_s3, 4  ;;  %s100_s28 = int_to_ptr.hbm [resolvable:$true] %s99_s28 }
   0xd   :  { %v47_v2 = vadd.f32 %v46_v1, %v45_v0  ;;  %v78_v29 = vld [vmem:[#allocation5] sm:$0x1]  ;;  %v80_v32 = vld [vmem:[%s243_s2] sm:$0x1]  ;;  %s97_s25 = sshll.u32 %s202_s24, 4  ;;  %s98_s25 = int_to_ptr.vmem [resolvable:$true] %s97_s25 }
   0xf   :  { %v48_v3 = vrot.slane %v47_v2, 4 }
  0x11   :  { %v49_v4 = vadd.f32 %v48_v3, %v47_v2 }
  0x13   :  { %v50_v5 = vrot.slane %v49_v4, 2 }
  0x15   :  { %v51_v6 = vadd.f32 %v50_v5, %v49_v4 }
  0x17   :  { %v52_v7 = vrot.slane %v51_v6, 1 }
  0x19   :  { %v53_v8 = vadd.f32 %v52_v7, %v51_v6 }
  0x1b   :  { %v54_v9 = vmul.f32 0.0625, %v53_v8 }
  0x1d   :  { %v55_v10 = vsub.f32 %v45_v0, %v54_v9  ;;  %v56_v11 = vsub.f32 %v46_v1, %v54_v9 }
  0x1f   :  { %v57_v12 = vmul.f32 %v55_v10, %v55_v10  ;;  %v58_v13 = vmul.f32 %v56_v11, %v56_v11 }
  0x21   :  { %v59_v14 = vadd.f32 %v58_v13, %v57_v12 }
  0x23   :  { %v60_v15 = vrot.slane %v59_v14, 4 }
  0x25   :  { %v61_v16 = vadd.f32 %v60_v15, %v59_v14 }
  0x27   :  { %v62_v17 = vrot.slane %v61_v16, 2 }
  0x29   :  { %v63_v18 = vadd.f32 %v62_v17, %v61_v16 }
  0x2b   :  { %v64_v19 = vrot.slane %v63_v18, 1 }
  0x2d   :  { %v65_v20 = vadd.f32 %v64_v19, %v63_v18 }
  0x2f   :  { %v66_v21 = vmul.f32 0.0625, %v65_v20 }
  0x31   :  { %v67_v22 = vadd.f32 1e-05, %v66_v21 }
  0x33   :  { %118 = vrsqrt.f32 %v67_v22  ;;  %vm74_vm0 = vweird.f32 %v67_v22 }
  0x39   :  { %v119_v23 = vpop.eup %118 }
  0x3a   :  { %v69_v24 = vmul.f32 %v119_v23, %v67_v22  ;;  %vm75_vm1 = vweird.f32 %v119_v23 }
  0x3b   :  { %vm76_vm2 = vmor %vm74_vm0, %vm75_vm1 }
  0x3c   :  { %v70_v25 = vmul.f32 %v119_v23, %v69_v24 }
  0x3e   :  { %v71_v26 = vmul.f32 0.5, %v70_v25 }
  0x40   :  { %v72_v27 = vsub.f32 1.5, %v71_v26 }
  0x42   :  { %v73_v28 = vmul.f32 %v119_v23, %v72_v27 }
  0x44   :  { %v77_v30 = vsel %vm76_vm2, %v119_v23, %v73_v28 }
  0x45   :  { %v79_v31 = vmul.f32 %v78_v29, %v77_v30 }
  0x47   :  { %v81_v33 = vmul.f32 %v79_v31, %v54_v9  ;;  %v83_v34 = vperm.slane %v79_v31, 0 }
  0x49   :  { %v82_v35 = vsub.f32 %v80_v32, %v81_v33  ;;  %v84_v36 = vmul.f32 %v83_v34, %v45_v0  ;;  %v85_v37 = vmul.f32 %v83_v34, %v46_v1 }
  0x4b   :  { %v87_v38 = vperm.slane %v82_v35, 0 }
  0x4d   :  { %v89_v39 = vadd.f32 %v87_v38, %v84_v36  ;;  %v90_v40 = vadd.f32 %v87_v38, %v85_v37 }
  0x4f   :  { %91 = vst [vmem:[#allocation7] sm:$0xff] %v89_v39 }
  0x50   :  { %92 = vst [vmem:[#allocation7 + $0x8] sm:$0xff] %v90_v40 }
  0x51   :  { %105 = dma.vmem_to_hbm [thread:$0]  %s98_s25, 256, %s100_s28, [#allocation4], %s199_s20, %s199_s20, %s200_s21  }
  0x52   :  { %196 = dma.done.wait [#allocation4], 256  }
  0x53   :  { %197 = vsyncadd [#allocation4], 4294967040 }
  0x54   :  { %110 = vsyncpa [#allocation3], 1 }
  0x55   :  { %111 = vsyncpa [#allocation6], 1 }
  0x56   :  { %112 = vsyncpa [#allocation4], 1 }

</bundles_post_ra>
